<compile_context>
chip_gen: v7x
topology: tpu7x:2x2x1
jax: 0.10.0
libtpu: 0.0.40
codegen_flags: <defaults>
</compile_context>

<pallas_src>
import numpy as np
import jax
import jax.numpy as jnp
from jax.experimental import pallas as pl
from jax.experimental.pallas import tpu as pltpu


def _drop_path_kernel(x_ref, scale_ref, out_ref):
    # x_ref: (TB, TF) tile, scale_ref: (TB, 1) per-sample scale in x.dtype.
    # Pure lane-dense broadcast multiply -> kernel is cleanly HBM-bound.
    out_ref[...] = x_ref[...] * scale_ref[...]


def _choose_tiles(B, F, itemsize, budget_bytes=2 << 20):
    """Jointly pick (TB, TF) with TB*TF*itemsize <= budget_bytes.

    F must already be a multiple of 128 (caller pads).  Prefers wide,
    lane-dense feature tiles, sublane-aligned row tiles, and >= 2 row tiles
    when B allows (so both v7x TensorCores get work).
    """
    # Feature tile: largest multiple-of-128 divisor of F that still leaves
    # room for at least 8 rows within the byte budget.
    max_tf = max(128, (budget_bytes // (8 * itemsize)) // 128 * 128)
    tf = 128
    t = 128
    while t <= F:
        if F % t == 0 and t <= max_tf:
            tf = t
        t += 128

    # Row tile: largest multiple-of-8 divisor of B within the remaining budget.
    if B % 8 != 0:
        # Sublane dim must equal the full array dim when not a multiple of 8.
        return B, tf

    max_tb = max(8, budget_bytes // (tf * itemsize))

    def best_div(limit):
        best, d = 8, 8
        while d <= limit:
            if B % d == 0 and d <= max_tb:
                best = d
            d += 8
        return best

    tb = best_div(B)
    if tb == B and B >= 16:      # keep >= 2 row tiles for v7x megacore sharding
        tb = best_div(B // 2)
    return tb, tf


def drop_path(x, drop_prob=0.0, training=False, *, key=None):
    """Pallas TPU implementation of DropPath.forward (stochastic depth)."""
    if drop_prob == 0.0 or not training:
        return x                                  # identity, same as PyTorch

    if key is None:
        key = jax.random.PRNGKey(0)
    keep_prob = 1.0 - float(drop_prob)

    B = int(x.shape[0])
    F = 1
    for s in x.shape[1:]:
        F *= int(s)
    F = max(F, 1)
    xf = x.reshape(B, F)

    # Per-sample Bernoulli(keep_prob) scale in {0, 1/keep_prob}: computed once
    # here (hoisted out of every feature tile), cast to x.dtype once so the
    # kernel multiplies in native dtype.
    u = jax.random.uniform(key, (B, 1), dtype=jnp.float32)
    scale = (jnp.floor(keep_prob + u) * (1.0 / keep_prob)).astype(x.dtype)

    # Pad features to a multiple of 128 -> unmasked lane-dense vector stores.
    F_pad = ((F + 127) // 128) * 128
    if F_pad != F:
        xf = jnp.pad(xf, ((0, 0), (0, F_pad - F)))

    TB, TF = _choose_tiles(B, F_pad, jnp.dtype(x.dtype).itemsize)
    grid = (B // TB, F_pad // TF)

    out = pl.pallas_call(
        _drop_path_kernel,
        out_shape=jax.ShapeDtypeStruct((B, F_pad), x.dtype),
        grid_spec=pltpu.PrefetchScalarGridSpec(
            num_scalar_prefetch=0,
            grid=grid,
            in_specs=[
                pl.BlockSpec((TB, TF), lambda b, f: (b, f)),   # x tile
                pl.BlockSpec((TB, 1), lambda b, f: (b, 0)),    # per-sample scale
            ],
            out_specs=pl.BlockSpec((TB, TF), lambda b, f: (b, f)),
        ),
        compiler_params=pltpu.CompilerParams(
            dimension_semantics=("parallel", "parallel")),
    )(xf, scale)

    if F_pad != F:
        out = out[:, :F]
    return out.reshape(x.shape)


if __name__ == "__main__":
    key = jax.random.PRNGKey(0)
    kx, kd = jax.random.split(key)

    # Small shape consistent with how DropPath is used inside HTSAT/Swin blocks.
    B, C, H, W = 2, 4, 16, 16                     # F = 1024 (lane-dense)
    x = jax.random.normal(kx, (B, C, H, W), dtype=jnp.float32)

    drop_prob = 0.5
    keep_prob = 1.0 - drop_prob

    # Training path (stochastic depth active) -> Pallas kernel.
    y = jax.block_until_ready(drop_path(x, drop_prob, training=True, key=kd))
    xn, yn = np.asarray(x), np.asarray(y)

    # Defining property of drop_path: each sample is either entirely dropped
    # (all zeros) or scaled by exactly 1/keep_prob.
    for b in range(B):
        if np.all(yn[b] == 0.0):
            continue
        np.testing.assert_allclose(yn[b], xn[b] / keep_prob, rtol=1e-6, atol=1e-6)

    # Determinism: same key -> identical per-sample mask.
    y_again = jax.block_until_ready(drop_path(x, drop_prob, training=True, key=kd))
    np.testing.assert_array_equal(np.asarray(y_again), yn)

    # Eval mode and drop_prob == 0 are exact identities (no kernel launched).
    np.testing.assert_array_equal(
        np.asarray(drop_path(x, drop_prob, training=False)), xn)
    np.testing.assert_array_equal(
        np.asarray(drop_path(x, 0.0, training=True)), xn)

    # Second config: bf16 input, ragged F (105 -> padded to 128), multi-tile
    # batch (B=24 -> row tiles of 8).  keep_prob=0.5 so the bf16 scale (2.0)
    # is exact and the check is bit-precise.
    x2 = jax.random.normal(kx, (24, 3, 7, 5), dtype=jnp.bfloat16)
    y2 = jax.block_until_ready(drop_path(x2, 0.5, training=True, key=kd))
    assert y2.shape == x2.shape and y2.dtype == x2.dtype
    x2n = np.asarray(x2.astype(jnp.float32))
    y2n = np.asarray(y2.astype(jnp.float32))
    for b in range(x2.shape[0]):
        if np.all(y2n[b] == 0.0):
            continue
        np.testing.assert_array_equal(y2n[b], x2n[b] * 2.0)

    print("KERNEL_OK")
</pallas_src>

<mosaic_0001>
module attributes {stable_mosaic.version = 11 : i64} {
  func.func @_drop_path_kernel(%arg0: i32, %arg1: i32, %arg2: memref<2x1024xf32, #tpu.memory_space<vmem>>, %arg3: memref<2x1xf32, #tpu.memory_space<vmem>>, %arg4: memref<2x1024xf32, #tpu.memory_space<vmem>>) attributes {dimension_semantics = [#tpu.dimension_semantics<parallel>, #tpu.dimension_semantics<parallel>], iteration_bounds = array<i64: 1, 1>, scalar_prefetch = 0 : i64, scratch_operands = 0 : i64, tpu.core_type = #tpu.core_type<tc>, window_params = [{transform_indices = @transform_0, window_bounds = array<i64: 2, 1024>}, {transform_indices = @transform_1, window_bounds = array<i64: 2, 1>}, {transform_indices = @transform_2, window_bounds = array<i64: 2, 1024>}]} {
    %c0 = arith.constant 0 : index
    %c0_0 = arith.constant 0 : index
    %0 = vector.load %arg2[%c0, %c0_0] : memref<2x1024xf32, #tpu.memory_space<vmem>>, vector<2x1024xf32>
    %c0_1 = arith.constant 0 : index
    %c0_2 = arith.constant 0 : index
    %1 = vector.load %arg3[%c0_1, %c0_2] : memref<2x1xf32, #tpu.memory_space<vmem>>, vector<2x1xf32>
    %2 = vector.broadcast %1 : vector<2x1xf32> to vector<2x1024xf32>
    %3 = arith.mulf %0, %2 : vector<2x1024xf32>
    %c0_3 = arith.constant 0 : index
    %c0_4 = arith.constant 0 : index
    %4 = vector.load %arg4[%c0_3, %c0_4] : memref<2x1024xf32, #tpu.memory_space<vmem>>, vector<2x1024xf32>
    tpu.vector_store %arg4[%c0_3, %c0_4], %3 {strides = array<i32>} : memref<2x1024xf32, #tpu.memory_space<vmem>>, vector<2x1024xf32>,
    return
  }
  func.func @transform_0(%arg0: i32, %arg1: i32) -> (i32, i32) {
    %c0_i32 = arith.constant 0 : i32
    return %arg0, %arg1 : i32, i32
  }
  func.func @transform_1(%arg0: i32, %arg1: i32) -> (i32, i32) {
    %c0_i32 = arith.constant 0 : i32
    %c0_i32_0 = arith.constant 0 : i32
    return %arg0, %c0_i32 : i32, i32
  }
  func.func @transform_2(%arg0: i32, %arg1: i32) -> (i32, i32) {
    %c0_i32 = arith.constant 0 : i32
    return %arg0, %arg1 : i32, i32
  }
}

</mosaic_0001>

<bundles_post_ra>
// kernel: tpu_custom_call.1
= control target key start
LH: loop header
LB: loop body
LE: loop exit
PB: predicated region body
PF: predicated region fallthrough
CT: control target
= control target key end

     0   :  { %7 = vsyncpa [#allocation3], 0  ;;  %s157_s0 = inlined_call_operand.hbm [shape: f32[2,1024], index: 0, kind: input, shape index: {}]   ;;  %s158_s1 = inlined_call_operand.vmem [shape: f32[2,1], index: 1, kind: input, shape index: {}]   ;;  %s159_s2 = inlined_call_operand.hbm [shape: f32[2,1024], index: 2, kind: output, shape index: {}]  }
   0x1   :  { %8 = vsyncpa [#allocation4], 0  ;;  %s111_s9 = smov [#allocation2]   ;;  %s63_s13 = scalar_lea.hbm %s157_s0, 256 }
   0x2   :  { %s15_s10 = sshll.u32 %s111_s9, 4  ;;  %p64_p0 = scmp.ne.s32.totalorder %s157_s0, %s63_s13  ;;  %s16_s10 = int_to_ptr.vmem [resolvable:$true] %s15_s10 }
   0x3   :  { %p67_p1 = scmp.lt.u32.totalorder %s63_s13, %s157_s0 }
   0x5   :  { %p69_p2 = pnand %p67_p1, %p64_p0 }
   0x7   :  { %72 = shalt.err (!%p69_p2)
}
   0x8   :  { %s73_s18 = scalar_lea.vmem %s16_s10, 256  ;;  %p78_p4 = scmp.lt.s32.totalorder %s16_s10, %s16_s10 }
   0x9   :  { %p74_p3 = scmp.ne.s32.totalorder %s16_s10, %s73_s18  ;;  %p79_p5 = scmp.lt.s32.totalorder %s73_s18, %s73_s18 }
   0xb   :  { %p80_p6 = por %p79_p5, %p78_p4 }
   0xd   :  { %p81_p7 = pnand %p80_p6, %p74_p3 }
   0xf   :  { %84 = shalt.err (!%p81_p7)
}
  0x10   :  { %18 = dma.hbm_to_vmem [thread:$0]  %s157_s0, 256, %s16_s10, [#allocation3]  }
  0x11   :  { %107 = dma.done.wait [#allocation3], 256  }
  0x12   :  { %108 = vsyncadd [#allocation3], 4294967040  ;;  %v112_v0 = vmov 0   ;;  %v26_v1 = vld [vmem:[%s158_s1] sm:$0x3]  ;;  %v34_v4 = vlaneseq  ;;  %v25_v10 = vld [vmem:[#allocation2 + $0x8] sm:$0xff] }
  0x13   :  { %62 = vset.pattern.permute.xlu0 %v112_v0  ;;  %v113_v2 = vmov 269488144   ;;  %v24_v9 = vld [vmem:[#allocation2] sm:$0xff]  ;;  %s114_s23 = smov [#allocation5]  }
  0x14   :  { %29 = vperm.xlu0 %62, %v26_v1   ;;  %v32_v3 = vunpack.c.l.s4 %v113_v2  ;;  %v35_v6 = vshrl.u32 %v34_v4, 7  ;;  %s49_s0 = sshll.u32 %s114_s23, 4  ;;  %s50_s0 = int_to_ptr.vmem [resolvable:$true] %s49_s0 }
  0x15   :  { %s85_s24 = scalar_lea.vmem %s50_s0, 256  ;;  %p90_p9 = scmp.lt.s32.totalorder %s50_s0, %s50_s0 }
  0x16   :  { %v33_v5 = vunpack.c.0.s8 %v32_v3  ;;  %p86_p8 = scmp.ne.s32.totalorder %s50_s0, %s85_s24  ;;  %p91_p10 = scmp.lt.s32.totalorder %s85_s24, %s85_s24 }
  0x18   :  { %v36_v7 = vsub.s32 %v33_v5, %v35_v6  ;;  %p92_p11 = por %p91_p10, %p90_p9 }
  0x1a   :  { %p93_p12 = pnand %p92_p11, %p86_p8 }
  0x93   :  { %v30_v8 = vpop.permute.xlu0 %29 }
  0x94   :  { %v37_v11 = vrot.slane %v30_v8, %v36_v7 }
  0x96   :  { %v39_v12 = vmul.f32 %v37_v11, %v24_v9  ;;  %v40_v13 = vmul.f32 %v37_v11, %v25_v10 }
  0x98   :  { %41 = vst [vmem:[#allocation5] sm:$0xff] %v39_v12  ;;  %42 = vst [vmem:[#allocation5 + $0x8] sm:$0xff] %v40_v13 }
  0x99   :  { %96 = shalt.err (!%p93_p12)
}
  0x9a   :  { %s97_s26 = scalar_lea.hbm %s159_s2, 256 }
  0x9b   :  { %p98_p13 = scmp.ne.s32.totalorder %s159_s2, %s97_s26  ;;  %p101_p0 = scmp.lt.u32.totalorder %s97_s26, %s159_s2 }
  0x9d   :  { %p103_p1 = pnand %p101_p0, %p98_p13 }
  0x9f   :  { %106 = shalt.err (!%p103_p1)
}
  0xa0   :  { %52 = dma.vmem_to_hbm [thread:$0]  %s50_s0, 256, %s159_s2, [#allocation4]  }
  0xa1   :  { %109 = dma.done.wait [#allocation4], 256  }
  0xa2   :  { %110 = vsyncadd [#allocation4], 4294967040 }
  0xa3   :  { %56 = vsyncpa [#allocation3], 1 }
  0xa4   :  { %57 = vsyncpa [#allocation4], 1 }

</bundles_post_ra>
